<compile_context>
chip_gen: v7x
topology: tpu7x:2x2x1
jax: 0.10.0
libtpu: 0.0.40
codegen_flags: <defaults>
</compile_context>

<pallas_src>
import jax
import jax.numpy as jnp
from jax.experimental import pallas as pl
from jax.experimental.pallas import tpu as pltpu

# Layer sizes of the autoencoder (matches the nn.Linear dims in __init__).
LAYER_DIMS = [28 * 28, 128, 64, 32, 16, 32, 64, 128, 28 * 28]
NUM_LAYERS = len(LAYER_DIMS) - 1  # 8 linear layers
D_IN = LAYER_DIMS[0]              # 784


def _round_up(x, m):
    return (x + m - 1) // m * m


def _autoencoder_kernel(x_ref, *refs):
    """Whole forward pass for one batch tile, fully in VMEM.

    refs = (w1, b1, w2, b2, ..., w8, b8, o_ref)
    Weights are bf16 [in, out]; biases are f32 [1, out]; x/out are f32 (·,784).
    """
    o_ref = refs[-1]
    param_refs = refs[:-1]

    # bf16 operands + f32 MXU accumulation.
    h = x_ref[...].astype(jnp.bfloat16)          # [tile, 784]
    for layer in range(NUM_LAYERS):
        w = param_refs[2 * layer][...]           # bf16 [in, out]
        b = param_refs[2 * layer + 1][...]       # f32  [1, out]
        y = jnp.dot(h, w, preferred_element_type=jnp.float32) + b
        if layer == NUM_LAYERS - 1:
            o_ref[...] = jnp.tanh(y)             # decoder ends with Tanh; f32 out
        else:
            if layer != 3:
                # ReLU after every Linear except the encoder's final
                # Linear(32,16) (the Sequential ends with a bare Linear).
                y = jnp.maximum(y, 0.0)
            h = y.astype(jnp.bfloat16)


def _choose_tile(B, batch_tile):
    """Batch tile: multiple of 8 (f32 sublane), capped by B and batch_tile."""
    tile = min(batch_tile, _round_up(B, 8))
    # v7x megacore: guarantee >= 2 grid steps when the batch allows it, so the
    # "parallel" batch axis can shard across both TensorCores.
    if B >= 16:
        tile = min(tile, _round_up(pl.cdiv(B, 2), 8))
    return max(8, _round_up(tile, 8))


def autoencoder_forward(x, params, *, batch_tile=1024):
    """x: [B, 784] float32. params: list of (W[in,out], b[1,out]) per layer.

    Returns [B, 784] float32 (same semantics as the PyTorch Net.forward).
    """
    B, D = x.shape
    assert D == D_IN

    tile = _choose_tile(B, batch_tile)
    grid = (pl.cdiv(B, tile),)

    # Parameters: weights as bf16 [in, out], biases as f32 [1, out].
    flat_params = []
    for w, b in params:
        flat_params.append(w.astype(jnp.bfloat16))
        flat_params.append(b.reshape(1, -1).astype(jnp.float32))

    # ---- advisory cost estimate ------------------------------------------
    mac = sum(LAYER_DIMS[l] * LAYER_DIMS[l + 1] for l in range(NUM_LAYERS))
    param_bytes = sum(int(p.size) * p.dtype.itemsize for p in flat_params)
    cost = pl.CostEstimate(
        flops=2 * mac * B,
        transcendentals=B * D_IN,                        # tanh on 784 out cols
        bytes_accessed=2 * B * D_IN * 4 + param_bytes,   # f32 x + f32 out
    )

    in_specs = [pl.BlockSpec((tile, D_IN), lambda i: (i, 0))]
    for p in flat_params:
        # Grid-invariant full-array blocks: constant index map, no re-DMA
        # across steps; default buffering is fine (<1 MiB total).
        in_specs.append(pl.BlockSpec(p.shape, lambda i: (0, 0)))
    out_specs = pl.BlockSpec((tile, D_IN), lambda i: (i, 0))

    return pl.pallas_call(
        _autoencoder_kernel,
        out_shape=jax.ShapeDtypeStruct((B, D_IN), jnp.float32),
        grid_spec=pltpu.PrefetchScalarGridSpec(
            num_scalar_prefetch=0,
            grid=grid,
            in_specs=in_specs,
            out_specs=out_specs,
        ),
        compiler_params=pltpu.CompilerParams(
            dimension_semantics=("parallel",),
            # ~20 MiB of double-buffered in/out blocks + weights + scratch at
            # tile=1024: fits v7x's 64 MiB physical VMEM with headroom, and is
            # well above v5e's 16 MiB scoped default.
            vmem_limit_bytes=48 * 1024 * 1024,
        ),
        cost_estimate=cost,
    )(x, *flat_params)


def init_params(key):
    """Deterministic PyTorch-style init: U(-1/sqrt(fan_in), 1/sqrt(fan_in))."""
    params = []
    for layer in range(NUM_LAYERS):
        fan_in = LAYER_DIMS[layer]
        fan_out = LAYER_DIMS[layer + 1]
        key, kw, kb = jax.random.split(key, 3)
        bound = 1.0 / jnp.sqrt(jnp.float32(fan_in))
        # Stored as [in, out] (transposed relative to torch's [out, in]).
        w = jax.random.uniform(kw, (fan_in, fan_out), jnp.float32, -bound, bound)
        b = jax.random.uniform(kb, (1, fan_out), jnp.float32, -bound, bound)
        params.append((w, b))
    return params


def reference_forward(x, params):
    """Plain-JAX reference with the same bf16-operand / f32-accumulate math."""
    h = x.astype(jnp.bfloat16)
    for layer, (w, b) in enumerate(params):
        y = jnp.dot(h, w.astype(jnp.bfloat16),
                    preferred_element_type=jnp.float32) + b.reshape(1, -1)
        if layer == NUM_LAYERS - 1:
            return jnp.tanh(y)                   # f32 output
        if layer != 3:
            y = jnp.maximum(y, 0.0)
        h = y.astype(jnp.bfloat16)


if __name__ == "__main__":
    key = jax.random.PRNGKey(0)
    key, kx = jax.random.split(key)

    # Small demo batch; tile logic picks tile=24 -> a 2-step grid (exercises
    # the multi-step "parallel" batch axis) with exact block division.
    B = 48
    x = jax.random.normal(kx, (B, 28 * 28), dtype=jnp.float32)

    params = init_params(key)

    out = jax.block_until_ready(autoencoder_forward(x, params))

    ref = reference_forward(x, params)
    assert out.shape == (B, 28 * 28)
    # bf16 operands (f32 accumulation): tolerance loosened vs a pure-f32 check.
    assert jnp.allclose(out, ref, atol=2e-2, rtol=2e-2), "mismatch vs reference"

    print("KERNEL_OK")
</pallas_src>

<mosaic_0001>
module attributes {stable_mosaic.version = 11 : i64} {
  func.func @_autoencoder_kernel(%arg0: i32, %arg1: memref<24x784xf32, #tpu.memory_space<vmem>>, %arg2: memref<784x128xbf16, #tpu.memory_space<vmem>>, %arg3: memref<1x128xf32, #tpu.memory_space<vmem>>, %arg4: memref<128x64xbf16, #tpu.memory_space<vmem>>, %arg5: memref<1x64xf32, #tpu.memory_space<vmem>>, %arg6: memref<64x32xbf16, #tpu.memory_space<vmem>>, %arg7: memref<1x32xf32, #tpu.memory_space<vmem>>, %arg8: memref<32x16xbf16, #tpu.memory_space<vmem>>, %arg9: memref<1x16xf32, #tpu.memory_space<vmem>>, %arg10: memref<16x32xbf16, #tpu.memory_space<vmem>>, %arg11: memref<1x32xf32, #tpu.memory_space<vmem>>, %arg12: memref<32x64xbf16, #tpu.memory_space<vmem>>, %arg13: memref<1x64xf32, #tpu.memory_space<vmem>>, %arg14: memref<64x128xbf16, #tpu.memory_space<vmem>>, %arg15: memref<1x128xf32, #tpu.memory_space<vmem>>, %arg16: memref<128x784xbf16, #tpu.memory_space<vmem>>, %arg17: memref<1x784xf32, #tpu.memory_space<vmem>>, %arg18: memref<24x784xf32, #tpu.memory_space<vmem>>) attributes {dimension_semantics = [#tpu.dimension_semantics<parallel>], iteration_bounds = array<i64: 2>, scalar_prefetch = 0 : i64, scratch_operands = 0 : i64, tpu.core_type = #tpu.core_type<tc>, window_params = [{transform_indices = @transform_0, window_bounds = array<i64: 24, 784>}, {pipeline_mode = #tpu.pipeline_mode<synchronous>, transform_indices = @transform_1, window_bounds = array<i64: 784, 128>}, {pipeline_mode = #tpu.pipeline_mode<synchronous>, transform_indices = @transform_2, window_bounds = array<i64: 1, 128>}, {pipeline_mode = #tpu.pipeline_mode<synchronous>, transform_indices = @transform_3, window_bounds = array<i64: 128, 64>}, {pipeline_mode = #tpu.pipeline_mode<synchronous>, transform_indices = @transform_4, window_bounds = array<i64: 1, 64>}, {pipeline_mode = #tpu.pipeline_mode<synchronous>, transform_indices = @transform_5, window_bounds = array<i64: 64, 32>}, {pipeline_mode = #tpu.pipeline_mode<synchronous>, transform_indices = @transform_6, window_bounds = array<i64: 1, 32>}, {pipeline_mode = #tpu.pipeline_mode<synchronous>, transform_indices = @transform_7, window_bounds = array<i64: 32, 16>}, {pipeline_mode = #tpu.pipeline_mode<synchronous>, transform_indices = @transform_8, window_bounds = array<i64: 1, 16>}, {pipeline_mode = #tpu.pipeline_mode<synchronous>, transform_indices = @transform_9, window_bounds = array<i64: 16, 32>}, {pipeline_mode = #tpu.pipeline_mode<synchronous>, transform_indices = @transform_10, window_bounds = array<i64: 1, 32>}, {pipeline_mode = #tpu.pipeline_mode<synchronous>, transform_indices = @transform_11, window_bounds = array<i64: 32, 64>}, {pipeline_mode = #tpu.pipeline_mode<synchronous>, transform_indices = @transform_12, window_bounds = array<i64: 1, 64>}, {pipeline_mode = #tpu.pipeline_mode<synchronous>, transform_indices = @transform_13, window_bounds = array<i64: 64, 128>}, {pipeline_mode = #tpu.pipeline_mode<synchronous>, transform_indices = @transform_14, window_bounds = array<i64: 1, 128>}, {pipeline_mode = #tpu.pipeline_mode<synchronous>, transform_indices = @transform_15, window_bounds = array<i64: 128, 784>}, {pipeline_mode = #tpu.pipeline_mode<synchronous>, transform_indices = @transform_16, window_bounds = array<i64: 1, 784>}, {transform_indices = @transform_17, window_bounds = array<i64: 24, 784>}]} {
    %c0 = arith.constant 0 : index
    %c0_0 = arith.constant 0 : index
    %0 = vector.load %arg1[%c0, %c0_0] : memref<24x784xf32, #tpu.memory_space<vmem>>, vector<24x784xf32>
    %1 = arith.truncf %0 : vector<24x784xf32> to vector<24x784xbf16>
    %c0_1 = arith.constant 0 : index
    %c0_2 = arith.constant 0 : index
    %2 = vector.load %arg2[%c0_1, %c0_2] : memref<784x128xbf16, #tpu.memory_space<vmem>>, vector<784x128xbf16>
    %c0_3 = arith.constant 0 : index
    %c0_4 = arith.constant 0 : index
    %3 = vector.load %arg3[%c0_3, %c0_4] : memref<1x128xf32, #tpu.memory_space<vmem>>, vector<1x128xf32>
    %cst = arith.constant dense<0.000000e+00> : vector<24x128xf32>
    %4 = tpu.matmul %1, %2, %cst {dimension_numbers = #tpu.dot_dimension_numbers<[1], [0], [0], [1], [0, 0, 1, 1], [], []>} : vector<24x784xbf16>, vector<784x128xbf16>, vector<24x128xf32> -> vector<24x128xf32>
    %5 = vector.broadcast %3 : vector<1x128xf32> to vector<24x128xf32>
    %6 = arith.addf %4, %5 : vector<24x128xf32>
    %cst_5 = arith.constant 0.000000e+00 : f32
    %7 = vector.broadcast %cst_5 : f32 to vector<24x128xf32>
    %8 = arith.maximumf %6, %7 : vector<24x128xf32>
    %9 = arith.truncf %8 : vector<24x128xf32> to vector<24x128xbf16>
    %c0_6 = arith.constant 0 : index
    %c0_7 = arith.constant 0 : index
    %10 = vector.load %arg4[%c0_6, %c0_7] : memref<128x64xbf16, #tpu.memory_space<vmem>>, vector<128x64xbf16>
    %c0_8 = arith.constant 0 : index
    %c0_9 = arith.constant 0 : index
    %11 = vector.load %arg5[%c0_8, %c0_9] : memref<1x64xf32, #tpu.memory_space<vmem>>, vector<1x64xf32>
    %cst_10 = arith.constant dense<0.000000e+00> : vector<24x64xf32>
    %12 = tpu.matmul %9, %10, %cst_10 {dimension_numbers = #tpu.dot_dimension_numbers<[1], [0], [0], [1], [0, 0, 1, 1], [], []>} : vector<24x128xbf16>, vector<128x64xbf16>, vector<24x64xf32> -> vector<24x64xf32>
    %13 = vector.broadcast %11 : vector<1x64xf32> to vector<24x64xf32>
    %14 = arith.addf %12, %13 : vector<24x64xf32>
    %cst_11 = arith.constant 0.000000e+00 : f32
    %15 = vector.broadcast %cst_11 : f32 to vector<24x64xf32>
    %16 = arith.maximumf %14, %15 : vector<24x64xf32>
    %17 = arith.truncf %16 : vector<24x64xf32> to vector<24x64xbf16>
    %c0_12 = arith.constant 0 : index
    %c0_13 = arith.constant 0 : index
    %18 = vector.load %arg6[%c0_12, %c0_13] : memref<64x32xbf16, #tpu.memory_space<vmem>>, vector<64x32xbf16>
    %c0_14 = arith.constant 0 : index
    %c0_15 = arith.constant 0 : index
    %19 = vector.load %arg7[%c0_14, %c0_15] : memref<1x32xf32, #tpu.memory_space<vmem>>, vector<1x32xf32>
    %cst_16 = arith.constant dense<0.000000e+00> : vector<24x32xf32>
    %20 = tpu.matmul %17, %18, %cst_16 {dimension_numbers = #tpu.dot_dimension_numbers<[1], [0], [0], [1], [0, 0, 1, 1], [], []>} : vector<24x64xbf16>, vector<64x32xbf16>, vector<24x32xf32> -> vector<24x32xf32>
    %21 = vector.broadcast %19 : vector<1x32xf32> to vector<24x32xf32>
    %22 = arith.addf %20, %21 : vector<24x32xf32>
    %cst_17 = arith.constant 0.000000e+00 : f32
    %23 = vector.broadcast %cst_17 : f32 to vector<24x32xf32>
    %24 = arith.maximumf %22, %23 : vector<24x32xf32>
    %25 = arith.truncf %24 : vector<24x32xf32> to vector<24x32xbf16>
    %c0_18 = arith.constant 0 : index
    %c0_19 = arith.constant 0 : index
    %26 = vector.load %arg8[%c0_18, %c0_19] : memref<32x16xbf16, #tpu.memory_space<vmem>>, vector<32x16xbf16>
    %c0_20 = arith.constant 0 : index
    %c0_21 = arith.constant 0 : index
    %27 = vector.load %arg9[%c0_20, %c0_21] : memref<1x16xf32, #tpu.memory_space<vmem>>, vector<1x16xf32>
    %cst_22 = arith.constant dense<0.000000e+00> : vector<24x16xf32>
    %28 = tpu.matmul %25, %26, %cst_22 {dimension_numbers = #tpu.dot_dimension_numbers<[1], [0], [0], [1], [0, 0, 1, 1], [], []>} : vector<24x32xbf16>, vector<32x16xbf16>, vector<24x16xf32> -> vector<24x16xf32>
    %29 = vector.broadcast %27 : vector<1x16xf32> to vector<24x16xf32>
    %30 = arith.addf %28, %29 : vector<24x16xf32>
    %31 = arith.truncf %30 : vector<24x16xf32> to vector<24x16xbf16>
    %c0_23 = arith.constant 0 : index
    %c0_24 = arith.constant 0 : index
    %32 = vector.load %arg10[%c0_23, %c0_24] : memref<16x32xbf16, #tpu.memory_space<vmem>>, vector<16x32xbf16>
    %c0_25 = arith.constant 0 : index
    %c0_26 = arith.constant 0 : index
    %33 = vector.load %arg11[%c0_25, %c0_26] : memref<1x32xf32, #tpu.memory_space<vmem>>, vector<1x32xf32>
    %cst_27 = arith.constant dense<0.000000e+00> : vector<24x32xf32>
    %34 = tpu.matmul %31, %32, %cst_27 {dimension_numbers = #tpu.dot_dimension_numbers<[1], [0], [0], [1], [0, 0, 1, 1], [], []>} : vector<24x16xbf16>, vector<16x32xbf16>, vector<24x32xf32> -> vector<24x32xf32>
    %35 = vector.broadcast %33 : vector<1x32xf32> to vector<24x32xf32>
    %36 = arith.addf %34, %35 : vector<24x32xf32>
    %cst_28 = arith.constant 0.000000e+00 : f32
    %37 = vector.broadcast %cst_28 : f32 to vector<24x32xf32>
    %38 = arith.maximumf %36, %37 : vector<24x32xf32>
    %39 = arith.truncf %38 : vector<24x32xf32> to vector<24x32xbf16>
    %c0_29 = arith.constant 0 : index
    %c0_30 = arith.constant 0 : index
    %40 = vector.load %arg12[%c0_29, %c0_30] : memref<32x64xbf16, #tpu.memory_space<vmem>>, vector<32x64xbf16>
    %c0_31 = arith.constant 0 : index
    %c0_32 = arith.constant 0 : index
    %41 = vector.load %arg13[%c0_31, %c0_32] : memref<1x64xf32, #tpu.memory_space<vmem>>, vector<1x64xf32>
    %cst_33 = arith.constant dense<0.000000e+00> : vector<24x64xf32>
    %42 = tpu.matmul %39, %40, %cst_33 {dimension_numbers = #tpu.dot_dimension_numbers<[1], [0], [0], [1], [0, 0, 1, 1], [], []>} : vector<24x32xbf16>, vector<32x64xbf16>, vector<24x64xf32> -> vector<24x64xf32>
    %43 = vector.broadcast %41 : vector<1x64xf32> to vector<24x64xf32>
    %44 = arith.addf %42, %43 : vector<24x64xf32>
    %cst_34 = arith.constant 0.000000e+00 : f32
    %45 = vector.broadcast %cst_34 : f32 to vector<24x64xf32>
    %46 = arith.maximumf %44, %45 : vector<24x64xf32>
    %47 = arith.truncf %46 : vector<24x64xf32> to vector<24x64xbf16>
    %c0_35 = arith.constant 0 : index
    %c0_36 = arith.constant 0 : index
    %48 = vector.load %arg14[%c0_35, %c0_36] : memref<64x128xbf16, #tpu.memory_space<vmem>>, vector<64x128xbf16>
    %c0_37 = arith.constant 0 : index
    %c0_38 = arith.constant 0 : index
    %49 = vector.load %arg15[%c0_37, %c0_38] : memref<1x128xf32, #tpu.memory_space<vmem>>, vector<1x128xf32>
    %cst_39 = arith.constant dense<0.000000e+00> : vector<24x128xf32>
    %50 = tpu.matmul %47, %48, %cst_39 {dimension_numbers = #tpu.dot_dimension_numbers<[1], [0], [0], [1], [0, 0, 1, 1], [], []>} : vector<24x64xbf16>, vector<64x128xbf16>, vector<24x128xf32> -> vector<24x128xf32>
    %51 = vector.broadcast %49 : vector<1x128xf32> to vector<24x128xf32>
    %52 = arith.addf %50, %51 : vector<24x128xf32>
    %cst_40 = arith.constant 0.000000e+00 : f32
    %53 = vector.broadcast %cst_40 : f32 to vector<24x128xf32>
    %54 = arith.maximumf %52, %53 : vector<24x128xf32>
    %55 = arith.truncf %54 : vector<24x128xf32> to vector<24x128xbf16>
    %c0_41 = arith.constant 0 : index
    %c0_42 = arith.constant 0 : index
    %56 = vector.load %arg16[%c0_41, %c0_42] : memref<128x784xbf16, #tpu.memory_space<vmem>>, vector<128x784xbf16>
    %c0_43 = arith.constant 0 : index
    %c0_44 = arith.constant 0 : index
    %57 = vector.load %arg17[%c0_43, %c0_44] : memref<1x784xf32, #tpu.memory_space<vmem>>, vector<1x784xf32>
    %cst_45 = arith.constant dense<0.000000e+00> : vector<24x784xf32>
    %58 = tpu.matmul %55, %56, %cst_45 {dimension_numbers = #tpu.dot_dimension_numbers<[1], [0], [0], [1], [0, 0, 1, 1], [], []>} : vector<24x128xbf16>, vector<128x784xbf16>, vector<24x784xf32> -> vector<24x784xf32>
    %59 = vector.broadcast %57 : vector<1x784xf32> to vector<24x784xf32>
    %60 = arith.addf %58, %59 : vector<24x784xf32>
    %61 = math.tanh %60 : vector<24x784xf32>
    %c0_46 = arith.constant 0 : index
    %c0_47 = arith.constant 0 : index
    %62 = vector.load %arg18[%c0_46, %c0_47] : memref<24x784xf32, #tpu.memory_space<vmem>>, vector<24x784xf32>
    tpu.vector_store %arg18[%c0_46, %c0_47], %61 {strides = array<i32>} : memref<24x784xf32, #tpu.memory_space<vmem>>, vector<24x784xf32>,
    return
  }
  func.func @transform_0(%arg0: i32) -> (i32, i32) {
    %c0_i32 = arith.constant 0 : i32
    %c0_i32_0 = arith.constant 0 : i32
    return %arg0, %c0_i32 : i32, i32
  }
  func.func @transform_1(%arg0: i32) -> (i32, i32) {
    %c0_i32 = arith.constant 0 : i32
    %c0_i32_0 = arith.constant 0 : i32
    %c0_i32_1 = arith.constant 0 : i32
    return %c0_i32, %c0_i32_0 : i32, i32
  }
  func.func @transform_2(%arg0: i32) -> (i32, i32) {
    %c0_i32 = arith.constant 0 : i32
    %c0_i32_0 = arith.constant 0 : i32
    %c0_i32_1 = arith.constant 0 : i32
    return %c0_i32, %c0_i32_0 : i32, i32
  }
  func.func @transform_3(%arg0: i32) -> (i32, i32) {
    %c0_i32 = arith.constant 0 : i32
    %c0_i32_0 = arith.constant 0 : i32
    %c0_i32_1 = arith.constant 0 : i32
    return %c0_i32, %c0_i32_0 : i32, i32
  }
  func.func @transform_4(%arg0: i32) -> (i32, i32) {
    %c0_i32 = arith.constant 0 : i32
    %c0_i32_0 = arith.constant 0 : i32
    %c0_i32_1 = arith.constant 0 : i32
    return %c0_i32, %c0_i32_0 : i32, i32
  }
  func.func @transform_5(%arg0: i32) -> (i32, i32) {
    %c0_i32 = arith.constant 0 : i32
    %c0_i32_0 = arith.constant 0 : i32
    %c0_i32_1 = arith.constant 0 : i32
    return %c0_i32, %c0_i32_0 : i32, i32
  }
  func.func @transform_6(%arg0: i32) -> (i32, i32) {
    %c0_i32 = arith.constant 0 : i32
    %c0_i32_0 = arith.constant 0 : i32
    %c0_i32_1 = arith.constant 0 : i32
    return %c0_i32, %c0_i32_0 : i32, i32
  }
  func.func @transform_7(%arg0: i32) -> (i32, i32) {
    %c0_i32 = arith.constant 0 : i32
    %c0_i32_0 = arith.constant 0 : i32
    %c0_i32_1 = arith.constant 0 : i32
    return %c0_i32, %c0_i32_0 : i32, i32
  }
  func.func @transform_8(%arg0: i32) -> (i32, i32) {
    %c0_i32 = arith.constant 0 : i32
    %c0_i32_0 = arith.constant 0 : i32
    %c0_i32_1 = arith.constant 0 : i32
    return %c0_i32, %c0_i32_0 : i32, i32
  }
  func.func @transform_9(%arg0: i32) -> (i32, i32) {
    %c0_i32 = arith.constant 0 : i32
    %c0_i32_0 = arith.constant 0 : i32
    %c0_i32_1 = arith.constant 0 : i32
    return %c0_i32, %c0_i32_0 : i32, i32
  }
  func.func @transform_10(%arg0: i32) -> (i32, i32) {
    %c0_i32 = arith.constant 0 : i32
    %c0_i32_0 = arith.constant 0 : i32
    %c0_i32_1 = arith.constant 0 : i32
    return %c0_i32, %c0_i32_0 : i32, i32
  }
  func.func @transform_11(%arg0: i32) -> (i32, i32) {
    %c0_i32 = arith.constant 0 : i32
    %c0_i32_0 = arith.constant 0 : i32
    %c0_i32_1 = arith.constant 0 : i32
    return %c0_i32, %c0_i32_0 : i32, i32
  }
  func.func @transform_12(%arg0: i32) -> (i32, i32) {
    %c0_i32 = arith.constant 0 : i32
    %c0_i32_0 = arith.constant 0 : i32
    %c0_i32_1 = arith.constant 0 : i32
    return %c0_i32, %c0_i32_0 : i32, i32
  }
  func.func @transform_13(%arg0: i32) -> (i32, i32) {
    %c0_i32 = arith.constant 0 : i32
    %c0_i32_0 = arith.constant 0 : i32
    %c0_i32_1 = arith.constant 0 : i32
    return %c0_i32, %c0_i32_0 : i32, i32
  }
  func.func @transform_14(%arg0: i32) -> (i32, i32) {
    %c0_i32 = arith.constant 0 : i32
    %c0_i32_0 = arith.constant 0 : i32
    %c0_i32_1 = arith.constant 0 : i32
    return %c0_i32, %c0_i32_0 : i32, i32
  }
  func.func @transform_15(%arg0: i32) -> (i32, i32) {
    %c0_i32 = arith.constant 0 : i32
    %c0_i32_0 = arith.constant 0 : i32
    %c0_i32_1 = arith.constant 0 : i32
    return %c0_i32, %c0_i32_0 : i32, i32
  }
  func.func @transform_16(%arg0: i32) -> (i32, i32) {
    %c0_i32 = arith.constant 0 : i32
    %c0_i32_0 = arith.constant 0 : i32
    %c0_i32_1 = arith.constant 0 : i32
    return %c0_i32, %c0_i32_0 : i32, i32
  }
  func.func @transform_17(%arg0: i32) -> (i32, i32) {
    %c0_i32 = arith.constant 0 : i32
    %c0_i32_0 = arith.constant 0 : i32
    return %arg0, %c0_i32 : i32, i32
  }
}

</mosaic_0001>

<bundles_post_ra>
// kernel: tpu_custom_call.1
= control target key start
LH: loop header
LB: loop body
LE: loop exit
PB: predicated region body
PF: predicated region fallthrough
CT: control target
= control target key end

     0   :  { %s3823_s0 = inlined_call_operand.vmem [shape: f32[48,784], index: 0, kind: input, shape index: {}]   ;;  %s3824_s1 = inlined_call_operand.vmem [shape: bf16[784,128], index: 1, kind: input, shape index: {}]   ;;  %s3825_s2 = inlined_call_operand.vmem [shape: f32[1,128], index: 2, kind: input, shape index: {}]   ;;  %s3826_s3 = inlined_call_operand.vmem [shape: bf16[128,64], index: 3, kind: input, shape index: {}]   ;;  %s3827_s4 = inlined_call_operand.vmem [shape: f32[1,64], index: 4, kind: input, shape index: {}]   ;;  %s3828_s5 = inlined_call_operand.vmem [shape: bf16[64,32], index: 5, kind: input, shape index: {}]   ;;  %s3829_s6 = inlined_call_operand.vmem [shape: f32[1,32], index: 6, kind: input, shape index: {}]   ;;  %s3830_s7 = inlined_call_operand.vmem [shape: bf16[32,16], index: 7, kind: input, shape index: {}]   ;;  %s3831_s8 = inlined_call_operand.vmem [shape: f32[1,16], index: 8, kind: input, shape index: {}]   ;;  %s3832_s9 = inlined_call_operand.vmem [shape: bf16[16,32], index: 9, kind: input, shape index: {}]   ;;  %s3833_s10 = inlined_call_operand.vmem [shape: f32[1,32], index: 10, kind: input, shape index: {}]   ;;  %s3834_s11 = inlined_call_operand.vmem [shape: bf16[32,64], index: 11, kind: input, shape index: {}]   ;;  %s3835_s12 = inlined_call_operand.vmem [shape: f32[1,64], index: 12, kind: input, shape index: {}]   ;;  %s3836_s13 = inlined_call_operand.vmem [shape: bf16[64,128], index: 13, kind: input, shape index: {}]   ;;  %s3837_s14 = inlined_call_operand.vmem [shape: f32[1,128], index: 14, kind: input, shape index: {}]   ;;  %s3838_s15 = inlined_call_operand.vmem [shape: bf16[128,784], index: 15, kind: input, shape index: {}]   ;;  %s3839_s16 = inlined_call_operand.vmem [shape: f32[1,784], index: 16, kind: input, shape index: {}]   ;;  %s3840_s17 = inlined_call_operand.hbm [shape: f32[48,784], index: 17, kind: output, shape index: {}]  }
   0x1   :  { %3849 = sst [smem:[#allocation11_spill]] %s3823_s0 }
   0x2   :  { %3850 = sst [smem:[#allocation12_spill]] %s3824_s1 }
   0x3   :  { %3851 = sst [smem:[#allocation13_spill]] %s3840_s17 }
   0x4   :  { %22 = vsyncpa [#allocation3], 0 }
   0x5   :  { %24 = vsyncpa [#allocation3 + $0x1], 0  ;;  %s3229_s24 = smov 0   ;;  %s3231_s25 = smov 0  }
   0x6   :  { %s3233_s26 = smov 0   ;;  %s3235_s27 = smov 0  }
   0x7 LB: > { %3852 = sst [smem:[#allocation5_spill]] %s3121_s24  ;;  %s3250_s28 = sadd.s32 4294967295, %s3133_s27   ;;  %s3133_s27 = sphi %s3235_s27, %s3866_s27   ;;  %s3129_s26 = sphi %s3233_s26, %s3868_s26   ;;  %s3125_s25 = sphi %s3231_s25, %s3870_s25   ;;  %s3121_s24 = sphi %s3229_s24, %s3869_s24  }
   0x8   : > { %3853 = sst [smem:[#allocation6_spill]] %s3129_s26  ;;  %s2458_s29 = sadd.s32 4294967294, %s3133_s27  }
   0x9   : > { %3854 = sst [smem:[#allocation7_spill]] %s3133_s27  ;;  %s3254_s0 = sadd.s32 1, %s3133_s27  }
   0xa   : > { %3855 = sst [smem:[#allocation8_spill]] %s3254_s0  ;;  %s399_s30 = sadd.s32 1, %s3129_s26 }
   0xb   : > { %s396_s18 = ssub.s32 %s3133_s27, %s3254_s0  ;;  %p409_p0 = scmp.ne.s32.totalorder %s3129_s26, %s3125_s25 }
   0xc   : > { %p397_p1 = scmp.eq.s32.totalorder %s396_s18, 0  ;;  %p410_p2 = scmp.eq.s32.totalorder %s3250_s28, 1 }
   0xd   : > { %p415_p3 = scmp.ne.s32.totalorder %s3125_s25, %s3121_s24  ;;  %p416_p4 = scmp.eq.s32.totalorder %s2458_s29, 1 }
   0xe   : > { %s3265_s19 = scalar_select %p397_p1, %s3129_s26, %s399_s30  }
   0xf   : > { %p3267_p5 = por %p410_p2, %p409_p0  ;;  %p3271_p6 = por %p416_p4, %p415_p3 }
  0x10   : > { %3856 = sst [smem:[#allocation9_spill]] %s3265_s19  ;;  %p2461_p7 = scmp.ge.s32.totalorder %s3133_s27, 1 }
  0x11   : > { %s3858_s20 = scalar_select %p3271_p6, 1, 0 }
  0x12   : > { %p492_p8 = scmp.lt.s32.totalorder %s3133_s27, 3 }
  0x13   : > { %3859 = sst [smem:[#allocation10_spill]] %s3858_s20 }
  0x14   : > { %p493_p9 = pnand %p2461_p7, %p492_p8 }
  0x15   : > { %s3860_s23 = sld [smem:[#allocation12_spill]] (!%p493_p9)  ;;  %s545_s0 = smul.u32 (!%p493_p9), 3, %s3250_s28  ;;  %vm988_vm0 = vcmask (!%p493_p9), 130048   ;;  %vm1355_vm1 = vcmask (!%p493_p9), 523264   ;;  %vm1438_vm2 = vcmask (!%p493_p9), 261120  }
  0x16   : > { %496 = sbr.rel (%p493_p9) target bundleno = 1933 (0x78d), region = 88  ;;  %s3861_s17 = sld [smem:[#allocation11_spill]] (!%p493_p9) }
  0x17   : > { %p546_p10 = scmp.lt.s32.totalorder (!%p493_p9), %s545_s0, 5  ;;  %s2842_s26 = smul.u32 (!%p493_p9), 2688, %s3250_s28 }
  0x18   : > { %s3136_s21 = smov (!%p493_p9), [#allocation2]  }
  0x19   : > { %s3075_s22 = sshll.u32 (!%p493_p9), %s3136_s21, 4  ;;  %s3076_s22 = int_to_ptr.vmem [resolvable:$false] %s3075_s22 }
  0x1b   : > { %v2879_v0 = vld [vmem:[%s3860_s23 + $0x40] sm:$0xff] (!%p493_p9)   ;;  %v2883_v4 = vld [vmem:[%s3860_s23 + $0x48] sm:$0xff] (!%p493_p9)   ;;  %v2887_v8 = vld [vmem:[%s3860_s23 + $0x50] sm:$0xff] (!%p493_p9)  }
  0x1c   : > { %v2880_v1 = vld [vmem:[%s3860_s23] sm:$0xff] (!%p493_p9)   ;;  %2611 = vmatprep.subr.bf16.mxu0 (!%p493_p9), %v2879_v0  ;;  %v2884_v5 = vld [vmem:[%s3860_s23 + $0x8] sm:$0xff] (!%p493_p9)   ;;  %v2888_v9 = vld [vmem:[%s3860_s23 + $0x10] sm:$0xff] (!%p493_p9)  }
  0x1d   : > { %v2881_v2 = vld [vmem:[%s3860_s23 + $0xc0] sm:$0xff]   ;;  %2612 = vmatpush3.bf16.msra.mxu0 %v2880_v1  ;;  %v2885_v6 = vld [vmem:[%s3860_s23 + $0xc8] sm:$0xff]   ;;  %v2889_v10 = vld [vmem:[%s3860_s23 + $0xd0] sm:$0xff]   ;;  %s3872_s0 = smov (!%p546_p10, %s545_s0), 5 }
  0x1e   : > { %v2882_v3 = vld [vmem:[%s3860_s23 + $0x80] sm:$0xff]   ;;  %2639 = vmatprep.subr.bf16.mxu1 %v2881_v2  ;;  %2613 = vmatprep.subr.bf16.mxu0 %v2883_v4  ;;  %v2886_v7 = vld [vmem:[%s3860_s23 + $0x88] sm:$0xff]   ;;  %v2890_v11 = vld [vmem:[%s3860_s23 + $0x90] sm:$0xff]   ;;  %s2834_s19 = smul.u32 56, %s3872_s0  ;;  %s542_s0 = sand.u32 1, %s3125_s25  }
  0x1f   : > { %2640 = vmatpush3.bf16.msra.mxu1 %v2882_v3  ;;  %v2891_v12 = vld [vmem:[%s3860_s23 + $0x58] sm:$0xff]   ;;  %v2895_v16 = vld [vmem:[%s3860_s23 + $0x60] sm:$0xff]   ;;  %v2899_v20 = vld [vmem:[%s3860_s23 + $0x68] sm:$0xff]   ;;  %s2833_s18 = smul.u32 168, %s542_s0  ;;  %s3782_s28 = scalar_lea.sflag [#allocation3], %s542_s0 }
  0x20   : > { %2641 = vmatprep.subr.bf16.mxu1 %v2885_v6  ;;  %v2892_v13 = vld [vmem:[%s3860_s23 + $0x18] sm:$0xff]   ;;  %v2896_v17 = vld [vmem:[%s3860_s23 + $0x20] sm:$0xff]   ;;  %v2900_v21 = vld [vmem:[%s3860_s23 + $0x28] sm:$0xff]   ;;  %s3368_s27 = scalar_lea.vmem %s3861_s17, %s2834_s19  ;;  %s3862_s17 = sld [smem:[#allocation13_spill]] }
  0x21   : > { %2614 = vmatpush3.bf16.msra.mxu0 %v2884_v5  ;;  %v2893_v14 = vld [vmem:[%s3860_s23 + $0xd8] sm:$0xff]   ;;  %v2897_v18 = vld [vmem:[%s3860_s23 + $0xe0] sm:$0xff]   ;;  %v2901_v22 = vld [vmem:[%s3860_s23 + $0xe8] sm:$0xff]   ;;  %s3739_s29 = scalar_lea.vmem [#allocation2], %s2833_s18  ;;  %s3077_s18 = scalar_lea.vmem %s3076_s22, 5376 }
  0x22   : > { %2615 = vmatprep.subr.bf16.mxu0 %v2887_v8  ;;  %v2894_v15 = vld [vmem:[%s3860_s23 + $0x98] sm:$0xff]   ;;  %v2898_v19 = vld [vmem:[%s3860_s23 + $0xa0] sm:$0xff]   ;;  %v2902_v23 = vld [vmem:[%s3860_s23 + $0xa8] sm:$0xff]  }
  0x23   : > { %2642 = vmatpush3.bf16.msra.mxu1 %v2886_v7  ;;  %v2903_v24 = vld [vmem:[%s3860_s23 + $0x70] sm:$0xff]   ;;  %v2907_v28 = vld [vmem:[%s3860_s23 + $0x78] sm:$0xff]   ;;  %v555_v31 = vld [vmem:[%s3368_s27 + $0x8] sm:$0xff] }
  0x24   : > { %2643 = vmatprep.subr.bf16.mxu1 %v2889_v10  ;;  %v2904_v25 = vld [vmem:[%s3860_s23 + $0x30] sm:$0xff]   ;;  %v2908_v29 = vld [vmem:[%s3860_s23 + $0x38] sm:$0xff]   ;;  %v562_v32 = vld [vmem:[%s3368_s27 + $0x40] sm:$0xff] }
  0x25   : > { %2616 = vmatpush3.bf16.msra.mxu0 %v2888_v9  ;;  %v2905_v26 = vld [vmem:[%s3860_s23 + $0xf0] sm:$0xff]   ;;  %v2909_v30 = vld [vmem:[%s3860_s23 + $0xf8] sm:$0xff]   ;;  %v576_v33 = vpack.c.bf16 %v562_v32, %v555_v31  ;;  %v554_v35 = vld [vmem:[%s3368_s27] sm:$0xff] }
  0x26   : > { %2617 = vmatprep.subr.bf16.mxu0 %v2891_v12  ;;  %v2906_v27 = vld [vmem:[%s3860_s23 + $0xb0] sm:$0xff]   ;;  %v2910_v34 = vld [vmem:[%s3860_s23 + $0xb8] sm:$0xff]   ;;  %v2911_v38 = vld [vmem:[%s3860_s23 + $0x140] sm:$0xff]   ;;  %s3776_s19 = scalar_lea.hbm %s3862_s17, %s2842_s26 }
  0x27   : > { %2644 = vmatpush3.bf16.msra.mxu1 %v2890_v11  ;;  %v561_v36 = vld [vmem:[%s3368_s27 + $0x38] sm:$0xff]  ;;  %1027 = vmatprep.mubr.bf16.mxu0 %v576_v33  ;;  %v564_v40 = vld [vmem:[%s3368_s27 + $0x50] sm:$0xff]  ;;  %v2912_v42 = vld [vmem:[%s3860_s23 + $0x100] sm:$0xff]  }
  0x28   : > { %2645 = vmatprep.subr.bf16.mxu1 %v2893_v14  ;;  %v575_v37 = vpack.c.bf16 %v561_v36, %v554_v35  ;;  %v557_v39 = vld [vmem:[%s3368_s27 + $0x18] sm:$0xff]  ;;  %v556_v43 = vld [vmem:[%s3368_s27 + $0x10] sm:$0xff]  ;;  %v563_v44 = vld [vmem:[%s3368_s27 + $0x48] sm:$0xff] }
  0x29   : > { %2618 = vmatpush3.bf16.msra.mxu0 %v2892_v13  ;;  %v578_v41 = vpack.c.bf16 %v564_v40, %v557_v39  ;;  %v577_v45 = vpack.c.bf16 %v563_v44, %v556_v43  ;;  %v2913_v46 = vld [vmem:[%s3860_s23 + $0x148] sm:$0xff]   ;;  %v2915_v48 = vld [vmem:[%s3860_s23 + $0x150] sm:$0xff]   ;;  %v2917_v50 = vld [vmem:[%s3860_s23 + $0x158] sm:$0xff]  }
  0x2a   : > { %2619 = vmatprep.subr.bf16.mxu0 %v2895_v16  ;;  %v2914_v47 = vld [vmem:[%s3860_s23 + $0x108] sm:$0xff]   ;;  %v2916_v49 = vld [vmem:[%s3860_s23 + $0x110] sm:$0xff]   ;;  %v2918_v51 = vld [vmem:[%s3860_s23 + $0x118] sm:$0xff]  }
  0x2b   : > { %2646 = vmatpush3.bf16.msra.mxu1 %v2894_v15  ;;  %1075 = vmatprep.mubr.bf16.mxu1 %v578_v41  ;;  %v569_v52 = vld [vmem:[%s3368_s27 + $0x78] sm:$0xff]  ;;  %v2919_v53 = vld [vmem:[%s3860_s23 + $0x160] sm:$0xff]   ;;  %v568_v55 = vld [vmem:[%s3368_s27 + $0x70] sm:$0xff] }
  0x2c   : > { %2647 = vmatprep.subr.bf16.mxu1 %v2897_v18  ;;  %v583_v54 = vpack.c.bf16 %v569_v52, %v569_v52  ;;  %v582_v56 = vpack.c.bf16 %v568_v55, %v568_v55  ;;  %v571_v57 = vld [vmem:[%s3368_s27 + $0x88] sm:$0xff]  ;;  %v2920_v58 = vld [vmem:[%s3860_s23 + $0x120] sm:$0xff]   ;;  %v2923_v3 = vld [vmem:[%s3860_s23 + $0x170] sm:$0xff]  }
  0x2d   : > { %2620 = vmatpush3.bf16.msra.mxu0 %v2896_v17  ;;  %v585_v59 = vpack.c.bf16 %v571_v57, %v571_v57  ;;  %v2924_v60 = vld [vmem:[%s3860_s23 + $0x180] sm:$0xff]   ;;  %v2921_v62 = vld [vmem:[%s3860_s23 + $0x168] sm:$0xff]   ;;  %v560_v5 = vld [vmem:[%s3368_s27 + $0x30] sm:$0xff] }
  0x2e   : > { %2621 = vmatprep.subr.bf16.mxu0 %v2899_v20  ;;  %v570_v61 = vld [vmem:[%s3368_s27 + $0x80] sm:$0xff]  ;;  %v2922_v0 = vld [vmem:[%s3860_s23 + $0x128] sm:$0xff]   ;;  %v2925_v7 = vld [vmem:[%s3860_s23 + $0x130] sm:$0xff]  }
  0x2f   : > { %2648 = vmatpush3.bf16.msra.mxu1 %v2898_v19  ;;  %v584_v63 = vpack.c.bf16 %v570_v61, %v570_v61  ;;  %v559_v1 = vld [vmem:[%s3368_s27 + $0x28] sm:$0xff]  ;;  %v566_v2 = vld [vmem:[%s3368_s27 + $0x60] sm:$0xff]  ;;  %v2926_v10 = vld [vmem:[%s3860_s23 + $0x178] sm:$0xff]  }
  0x30   : > { %2649 = vmatprep.subr.bf16.mxu1 %v2901_v22  ;;  %v580_v4 = vpack.c.bf16 %v566_v2, %v559_v1  ;;  %v567_v6 = vld [vmem:[%s3368_s27 + $0x68] sm:$0xff]  ;;  %v574_v9 = vld [vmem:[%s3368_s27 + $0xa0] sm:$0xff]  ;;  %v2927_v12 = vld [vmem:[%s3860_s23 + $0x138] sm:$0xff]  }
  0x31   : > { %2622 = vmatpush3.bf16.msra.mxu0 %v2900_v21  ;;  %v581_v8 = vpack.c.bf16 %v567_v6, %v560_v5  ;;  %v588_v11 = vpack.c.bf16 %v574_v9, %v574_v9  ;;  %v558_v13 = vld [vmem:[%s3368_s27 + $0x20] sm:$0xff]  ;;  %v565_v14 = vld [vmem:[%s3368_s27 + $0x58] sm:$0xff]  ;;  %v572_v18 = vld [vmem:[%s3368_s27 + $0x90] sm:$0xff] }
  0x32   : > { %2623 = vmatprep.subr.bf16.mxu0 %v2903_v24  ;;  %v573_v15 = vld [vmem:[%s3368_s27 + $0x98] sm:$0xff]  ;;  %v579_v16 = vpack.c.bf16 %v565_v14, %v558_v13  ;;  %v586_v19 = vpack.c.bf16 %v572_v18, %v572_v18  ;;  %v2928_v20 = vld [vmem:[%s3826_s3] sm:$0xff]   ;;  %v2929_v21 = vld [vmem:[%s3826_s3 + $0x8] sm:$0xff]   ;;  %s2396_s27 = sshll.u32 %s3739_s29, 4  ;;  %s3771_s27 = int_to_ptr.vmem [resolvable:$true] %s2396_s27 }
  0x33   : > { %2650 = vmatpush3.bf16.msra.mxu1 %v2902_v23  ;;  %v587_v17 = vpack.c.bf16 %v573_v15, %v573_v15  ;;  %v2930_v22 = vld [vmem:[%s3826_s3 + $0x10] sm:$0xff]   ;;  %v2931_v23 = vld [vmem:[%s3826_s3 + $0x18] sm:$0xff]   ;;  %v2932_v24 = vld [vmem:[%s3826_s3 + $0x20] sm:$0xff]   ;;  %s3071_s30 = scalar_lea.vmem %s3771_s27, 2688  ;;  %p3078_p0 = scmp.lt.s32.totalorder %s3771_s27, %s3076_s22 }
  0x34   : > { %2651 = vmatprep.subr.bf16.mxu1 %v2905_v26  ;;  %v2934_v26 = vld [vmem:[%s3826_s3 + $0x30] sm:$0xff]   ;;  %v2463_v31 = vld [vmem:[%s3825_s2] ss:$0 sm:$0xff]  ;;  %p3072_p11 = scmp.ne.s32.totalorder %s3771_s27, %s3071_s30  ;;  %p3079_p1 = scmp.lt.s32.totalorder %s3077_s18, %s3071_s30 }
  0x35   : > { %2624 = vmatpush3.bf16.msra.mxu0 %v2904_v25  ;;  %v2933_v25 = vld [vmem:[%s3826_s3 + $0x28] sm:$0xff]  }
  0x36   : > { %2625 = vmatprep.subr.bf16.mxu0 %v2907_v28  ;;  %v2936_v28 = vld [vmem:[%s3828_s5] sm:$0xff]   ;;  %p3073_p12 = pnand %p3072_p11, %p3267_p5  ;;  %p3080_p2 = por %p3079_p1, %p3078_p0 }
  0x37   : > { %2652 = vmatpush3.bf16.msra.mxu1 %v2906_v27  ;;  %v2935_v27 = vld [vmem:[%s3826_s3 + $0x38] sm:$0xff]  }
  0x38   : > { %2653 = vmatprep.subr.bf16.mxu1 %v2909_v30  ;;  %p3074_p13 = pneg %p3073_p12 }
  0x39   : > { %2626 = vmatpush3.bf16.msra.mxu0 %v2908_v29  ;;  %v2937_v29 = vld [vmem:[%s3828_s5 + $0x8] sm:$0xff]  }
  0x3a   : > { %2667 = vmatprep.subr.bf16.mxu0 %v2911_v38  ;;  %p3081_p3 = pnand %p3080_p2, %p3074_p13 }
  0x3b   : > { %2654 = vmatpush3.bf16.msra.mxu1 %v2910_v34 }
  0x3c   : > { %1028 = vmatmul.mubr.bf16.vlgmr.msra.gmra.mrb[0].mxu0 %v575_v37  ;;  %2741 = vmatprep.subr.bf16.mxu1 %v2924_v60 }
  0x3d   : > { %2668 = vmatpush3.bf16.msra.mxu0 %v2912_v42  ;;  %1035 = vmatprep.mubr.bf16.mxu0 %v583_v54 }
  0x3e   : > { %1076 = vmatmul.mubr.bf16.vlgmr.msra.gmra.mrb[0].mxu1 %v577_v45  ;;  %2669 = vmatprep.subr.bf16.mxu0 %v2913_v46 }
  0x3f   : > { %1083 = vmatprep.mubr.bf16.mxu1 %v585_v59  ;;  %2742 = vmatpush3.bf16.msra.mxu1 %v2924_v60 }
  0x40   : > { %2747 = vmatprep.subr.bf16.mxu1 %v2928_v20 }
  0x41   : > { %2670 = vmatpush3.bf16.msra.mxu0 %v2914_v47 }
  0x42   : > { %2671 = vmatprep.subr.bf16.mxu0 %v2915_v48 }
  0x44   : > { %1036 = vmatmul.mubr.bf16.gmra.mrb[4].mxu0 %v582_v56 }
  0x45   : > { %2672 = vmatpush3.bf16.msra.mxu0 %v2916_v49  ;;  %1123 = vmatprep.mubr.bf16.mxu0 %v580_v4 }
  0x46   : > { %2673 = vmatprep.subr.bf16.mxu0 %v2917_v50  ;;  %1084 = vmatmul.mubr.bf16.gmra.mrb[4].mxu1 %v584_v63 }
  0x47   : > { %2743 = vmatprep.mubr.msk.bf16.mxu1 %vm988_vm0, %v581_v8 }
  0x49   : > { %2674 = vmatpush3.bf16.msra.mxu0 %v2918_v51 }
  0x4a   : > { %2675 = vmatprep.subr.bf16.mxu0 %v2919_v53 }
  0x4d   : > { %2676 = vmatpush3.bf16.msra.mxu0 %v2920_v58 }
  0x4e   : > { %2677 = vmatprep.subr.bf16.mxu0 %v2921_v62  ;;  %2744 = vmatmul.mubr.msk.bf16.vlgmr.msra.gmra.mrb[8].mxu1 %vm988_vm0, %v588_v11 }
  0x4f   : > { %2748 = vmatpush3.bf16.msra.mxu1 %v2928_v20 }
  0x50   : > { %2749 = vmatprep.subr.bf16.mxu1 %v2929_v21 }
  0x51   : > { %2678 = vmatpush3.bf16.msra.mxu0 %v2922_v0 }
  0x52   : > { %2679 = vmatprep.subr.bf16.mxu0 %v2923_v3 }
  0x53   : > { %2750 = vmatpush3.bf16.msra.mxu1 %v2929_v21  ;;  %v2938_v21 = vld [vmem:[%s3828_s5 + $0x10] sm:$0xff]  }
  0x54   : > { %2751 = vmatprep.subr.bf16.mxu1 %v2930_v22 }
  0x55   : > { %2680 = vmatpush3.bf16.msra.mxu0 %v2925_v7 }
  0x56   : > { %2681 = vmatprep.subr.bf16.mxu0 %v2926_v10 }
  0x57   : > { %2752 = vmatpush3.bf16.msra.mxu1 %v2930_v22  ;;  %v2939_v22 = vld [vmem:[%s3828_s5 + $0x18] sm:$0xff]  }
  0x58   : > { %2753 = vmatprep.subr.bf16.mxu1 %v2931_v23 }
  0x59   : > { %2682 = vmatpush3.bf16.msra.mxu0 %v2927_v12 }
  0x5a   : > { %2767 = vmatprep.subr.bf16.mxu0 %v2936_v28 }
  0x5b   : > { %2754 = vmatpush3.bf16.msra.mxu1 %v2931_v23  ;;  %v2515_v23 = vld [vmem:[%s3827_s4] ss:$0 sm:$0xff] }
  0x5c   : > { %1124 = vmatmul.mubr.bf16.vlgmr.msra.gmra.mrb[8].mxu0 %v579_v16  ;;  %2755 = vmatprep.subr.bf16.mxu1 %v2932_v24 }
  0x5d   : > { %1131 = vmatprep.mubr.bf16.mxu0 %v587_v17  ;;  %2768 = vmatpush3.bf16.msra.mxu0 %v2936_v28 }
  0x5e   : > { %2769 = vmatprep.subr.bf16.mxu0 %v2937_v29 }
  0x5f   : > { %2756 = vmatpush3.bf16.msra.mxu1 %v2932_v24 }
  0x60   : > { %2757 = vmatprep.subr.bf16.mxu1 %v2933_v25 }
  0x61   : > { %2770 = vmatpush3.bf16.msra.mxu0 %v2937_v29 }
  0x62   : > { %2771 = vmatprep.subr.bf16.mxu0 %v2938_v21 }
  0x63   : > { %2758 = vmatpush3.bf16.msra.mxu1 %v2933_v25 }
  0x64   : > { %1132 = vmatmul.mubr.bf16.gmra.mrb[12].mxu0 %v586_v19  ;;  %2759 = vmatprep.subr.bf16.mxu1 %v2934_v26 }
  0x65   : > { %2772 = vmatpush3.bf16.msra.mxu0 %v2938_v21  ;;  %v2955_v21 = vld [vmem:[%s3838_s15 + $0x38] ss:$28 sps:$4 sm:$0xff]  }
  0x66   : > { %2773 = vmatprep.subr.bf16.mxu0 %v2939_v22 }
  0x67   : > { %2760 = vmatpush3.bf16.msra.mxu1 %v2934_v26 }
  0x68   : > { %2761 = vmatprep.subr.bf16.mxu1 %v2935_v27 }
  0x69   : > { %2774 = vmatpush3.bf16.msra.mxu0 %v2939_v22  ;;  %v2963_v22 = vld [vmem:[%s3838_s15 + $0x74] ss:$28 sps:$4 sm:$0xff]  }
  0x6b   : > { %2762 = vmatpush3.bf16.msra.mxu1 %v2935_v27 }
 0x10f   : > { %v2627_v30 = vpop.f32.mrb[0].mxu0 }
 0x110   : > { %v2628_v32 = vpop.f32.mrb[1].mxu0 }
 0x111   : > { %v2629_v33 = vadd.f32 %v2628_v32, %v2627_v30  ;;  %v2630_v34 = vpop.f32.mrb[2].mxu0  ;;  %v2655_v35 = vpop.f32.mrb[0].mxu1 }
 0x112   : > { %v2631_v36 = vpop.f32.mrb[3].mxu0  ;;  %v2656_v39 = vpop.f32.mrb[1].mxu1 }
 0x113   : > { %v1030_v37 = vadd.f32 %v2629_v33, %v2463_v31  ;;  %v2632_v38 = vadd.f32 %v2631_v36, %v2630_v34  ;;  %v2657_v40 = vadd.f32 %v2656_v39, %v2655_v35  ;;  %v2658_v41 = vpop.f32.mrb[2].mxu1  ;;  %v2940_v36 = vld [vmem:[%s3830_s7] sm:$0xff]  }
 0x114   : > { %v2659_v43 = vpop.f32.mrb[3].mxu1  ;;  %2779 = vmatprep.subr.bf16.mxu0 %v2940_v36 }
 0x115   : > { %v1033_v42 = vadd.f32 %v2632_v38, %v2463_v31  ;;  %v1078_v44 = vadd.f32 %v2657_v40, %v1030_v37  ;;  %v2660_v45 = vadd.f32 %v2659_v43, %v2658_v41  ;;  %v2941_v37 = vld [vmem:[%s3830_s7 + $0x8] sm:$0xff]   ;;  %v2524_v38 = vld [vmem:[%s3829_s6] ss:$0 sm:$0xff] }
 0x117   : > { %v1081_v46 = vadd.f32 %v2660_v45, %v1033_v42  ;;  %v2633_v47 = vpop.f32.mrb[4].mxu0 }
 0x118   : > { %v2634_v48 = vpop.f32.mrb[5].mxu0 }
 0x119   : > { %v2635_v49 = vadd.f32 %v2634_v48, %v2633_v47  ;;  %v2636_v50 = vpop.f32.mrb[6].mxu0  ;;  %v2661_v51 = vpop.f32.mrb[4].mxu1 }
 0x11a   : > { %v2637_v52 = vpop.f32.mrb[7].mxu0  ;;  %v2662_v53 = vpop.f32.mrb[5].mxu1 }
 0x11b   : > { %v1038_v54 = vadd.f32 %v2635_v49, %v2463_v31  ;;  %v2663_v55 = vadd.f32 %v2662_v53, %v2661_v51  ;;  %v2664_v56 = vpop.f32.mrb[6].mxu1  ;;  %v2942_v51 = vld [vmem:[%s3832_s9] sm:$0xff]  }
 0x11c   : > { %v2665_v57 = vpop.f32.mrb[7].mxu1  ;;  %2787 = vmatprep.subr.bf16.mxu1 %v2942_v51  ;;  %v2531_v53 = vld [vmem:[%s3831_s8] ss:$0 sm:$0xff] }
 0x11d   : > { %v1086_v58 = vadd.f32 %v2663_v55, %v1038_v54 }
 0x121   : > { %v2745_v59 = vpop.f32.mrb[8].mxu1 }
 0x122   : > { %v1173_v60 = vpop.f32.mrb[9].mxu1 }
 0x123   : > { %v2746_v61 = vpop.f32.mrb[10].mxu1 }
 0x124   : > { %v1176_v62 = vpop.f32.mrb[11].mxu1 }
 0x12f   : > { %v2683_v63 = vpop.f32.mrb[8].mxu0 }
 0x130   : > { %v2684_v0 = vpop.f32.mrb[9].mxu0 }
 0x131   : > { %v2685_v1 = vadd.f32 %v2684_v0, %v2683_v63  ;;  %v2686_v2 = vpop.f32.mrb[10].mxu0  ;;  %v2944_v63 = vld [vmem:[%s3834_s11 + $0x8] sm:$0xff]   ;;  %v2945_v0 = vld [vmem:[%s3836_s13] sm:$0xff]  }
 0x132   : > { %v2687_v3 = vpop.f32.mrb[11].mxu0 }
 0x133   : > { %v2688_v4 = vadd.f32 %v2687_v3, %v2686_v2  ;;  %v1126_v5 = vadd.f32 %v2685_v1, %v1078_v44  ;;  %v2946_v1 = vld [vmem:[%s3836_s13 + $0x8] sm:$0xff]   ;;  %v2536_v2 = vld [vmem:[%s3833_s10] ss:$0 sm:$0xff] }
 0x135   : > { %v1174_v6 = vadd.f32 %v1173_v60, %v1126_v5  ;;  %v1129_v7 = vadd.f32 %v2688_v4, %v1081_v46 }
 0x137   : > { %v1177_v8 = vadd.f32 %v1176_v62, %v1129_v7  ;;  %v2689_v9 = vpop.f32.mrb[12].mxu0  ;;  %v1187_v11 = vmax.f32 %v1174_v6, 0.0  ;;  %v2943_v62 = vld [vmem:[%s3834_s11] sm:$0xff]  }
 0x138   : > { %v2690_v10 = vpop.f32.mrb[13].mxu0 }
 0x139   : > { %v1188_v12 = vmax.f32 %v1177_v8, 0.0  ;;  %v2691_v13 = vadd.f32 %v2690_v10, %v2689_v9  ;;  %v2692_v14 = vpop.f32.mrb[14].mxu0 }
 0x13a   : > { %v2693_v15 = vpop.f32.mrb[15].mxu0 }
 0x13b   : > { %v1190_v16 = vpack.c.bf16 %v1188_v12, %v1187_v11  ;;  %v1134_v17 = vadd.f32 %v2691_v13, %v1086_v58  ;;  %v2947_v15 = vld [vmem:[%s3836_s13 + $0x10] sm:$0xff]  }
 0x13d   : > { %v1182_v18 = vadd.f32 %v2745_v59, %v1134_v17  ;;  %2763 = vmatprep.mubr.bf16.mxu1 %v1190_v16  ;;  %v2948_v16 = vld [vmem:[%s3836_s13 + $0x18] sm:$0xff]  }
 0x13e   : > { %v2949_v17 = vld [vmem:[%s3838_s15] ss:$28 sps:$4 sm:$0xff]  }
 0x13f   : > { %v1189_v19 = vmax.f32 %v1182_v18, 0.0  ;;  %v2951_v18 = vld [vmem:[%s3838_s15 + $0x4] ss:$28 sps:$4 sm:$0xff]  }
 0x141   : > { %v1191_v20 = vpack.c.bf16 %v1189_v19, %v1189_v19  ;;  %v2954_v19 = vld [vmem:[%s3838_s15 + $0xc] ss:$28 sps:$4 sm:$0xff]  }
 0x143   : > { %2764 = vmatmul.mubr.bf16.vlgmr.msra.gmra.mrb[12].mxu1 %v1191_v20  ;;  %v2957_v20 = vld [vmem:[%s3838_s15 + $0x3c] ss:$28 sps:$4 sm:$0xff]  }
 0x144   : > { %2788 = vmatpush3.bf16.msra.mxu1 %v2942_v51  ;;  %v2976_v51 = vld [vmem:[%s3838_s15 + $0xe8] ss:$28 sps:$4 sm:$0xff]  }
 0x145   : > { %2801 = vmatprep.subr.bf16.mxu1 %v2945_v0 }
 0x216   : > { %v2765_v24 = vpop.f32.mrb[12].mxu1 }
 0x217   : > { %v1306_v25 = vadd.f32 %v2765_v24, %v2515_v23  ;;  %v1297_v26 = vpop.f32.mrb[13].mxu1  ;;  %v2969_v24 = vld [vmem:[%s3838_s15 + $0xac] ss:$28 sps:$4 sm:$0xff]  }
 0x218   : > { %v1298_v27 = vadd.f32 %v2515_v23, %v1297_v26  ;;  %v2766_v28 = vpop.f32.mrb[14].mxu1  ;;  %v2975_v26 = vld [vmem:[%s3838_s15 + $0xe4] ss:$28 sps:$4 sm:$0xff]  }
 0x219   : > { %v1300_v29 = vpop.f32.mrb[15].mxu1  ;;  %v1313_v31 = vmax.f32 %v1306_v25, 0.0  ;;  %v2967_v25 = vld [vmem:[%s3838_s15 + $0xa8] ss:$28 sps:$4 sm:$0xff]   ;;  %v2981_v28 = vld [vmem:[%s3838_s15 + $0x11c] ss:$28 sps:$4 sm:$0xff]  }
 0x21a   : > { %v1301_v30 = vadd.f32 %v2515_v23, %v1300_v29  ;;  %v1311_v32 = vmax.f32 %v1298_v27, 0.0  ;;  %v2961_v23 = vld [vmem:[%s3838_s15 + $0x70] ss:$28 sps:$4 sm:$0xff]   ;;  %v2973_v27 = vld [vmem:[%s3838_s15 + $0xe0] ss:$28 sps:$4 sm:$0xff]  }
 0x21b   : > { %v1315_v35 = vpack.c.bf16 %v1313_v31, %v1313_v31  ;;  %v2979_v29 = vld [vmem:[%s3838_s15 + $0x118] ss:$28 sps:$4 sm:$0xff]  }
 0x21c   : > { %v1312_v33 = vmax.f32 %v1301_v30, 0.0  ;;  %v2540_v30 = vld [vmem:[%s3835_s12] ss:$0 sm:$0xff] }
 0x21e   : > { %v1314_v34 = vpack.c.bf16 %v1312_v33, %v1311_v32 }
 0x220   : > { %2775 = vmatprep.mubr.msk.bf16.mxu0 %vm1355_vm1, %v1314_v34 }
 0x221   : > { %2776 = vmatmul.mubr.msk.bf16.vlgmr.msra.gmra.mrb[16].mxu0 %vm1355_vm1, %v1315_v35 }
 0x222   : > { %2780 = vmatpush3.bf16.msra.mxu0 %v2940_v36 }
 0x223   : > { %2781 = vmatprep.subr.bf16.mxu0 %v2941_v37 }
 0x226   : > { %2782 = vmatpush3.bf16.msra.mxu0 %v2941_v37 }
 0x227   : > { %2793 = vmatprep.subr.bf16.mxu0 %v2943_v62 }
 0x2f4   : > { %v2777_v39 = vpop.f32.mrb[16].mxu0 }
 0x2f5   : > { %v1405_v40 = vadd.f32 %v2777_v39, %v2524_v38  ;;  %v1396_v41 = vpop.f32.mrb[17].mxu0 }
 0x2f6   : > { %v1397_v42 = vadd.f32 %v2524_v38, %v1396_v41  ;;  %v2778_v43 = vpop.f32.mrb[18].mxu0 }
 0x2f7   : > { %v1399_v44 = vpop.f32.mrb[19].mxu0  ;;  %v1412_v46 = vmax.f32 %v1405_v40, 0.0 }
 0x2f8   : > { %v1400_v45 = vadd.f32 %v2524_v38, %v1399_v44  ;;  %v1410_v47 = vmax.f32 %v1397_v42, 0.0  ;;  %v2952_v42 = vld [vmem:[%s3838_s15 + $0x8] ss:$28 sps:$4 sm:$0xff]  }
 0x2f9   : > { %v1414_v50 = vpack.c.bf16 %v1412_v46, %v1412_v46  ;;  %v2960_v44 = vld [vmem:[%s3838_s15 + $0x44] ss:$28 sps:$4 sm:$0xff]   ;;  %v2966_v46 = vld [vmem:[%s3838_s15 + $0x7c] ss:$28 sps:$4 sm:$0xff]  }
 0x2fa   : > { %v1411_v48 = vmax.f32 %v1400_v45, 0.0  ;;  %v2958_v45 = vld [vmem:[%s3838_s15 + $0x40] ss:$28 sps:$4 sm:$0xff]  }
 0x2fc   : > { %v1413_v49 = vpack.c.bf16 %v1411_v48, %v1410_v47  ;;  %v2964_v47 = vld [vmem:[%s3838_s15 + $0x78] ss:$28 sps:$4 sm:$0xff]  }
 0x2fd   : > { %v2972_v48 = vld [vmem:[%s3838_s15 + $0xb4] ss:$28 sps:$4 sm:$0xff]  }
 0x2fe   : > { %2783 = vmatprep.mubr.msk.bf16.mxu0 %vm1438_vm2, %v1413_v49  ;;  %v2970_v49 = vld [vmem:[%s3838_s15 + $0xb0] ss:$28 sps:$4 sm:$0xff]  }
 0x2ff   : > { %2784 = vmatmul.mubr.msk.bf16.vlgmr.msra.gmra.mrb[20].mxu0 %vm1438_vm2, %v1414_v50  ;;  %v2978_v50 = vld [vmem:[%s3838_s15 + $0xec] ss:$28 sps:$4 sm:$0xff]  }
 0x300   : > { %2794 = vmatpush3.bf16.msra.mxu0 %v2943_v62  ;;  %v2999_v62 = vld [vmem:[%s3838_s15 + $0x14] ss:$28 sps:$4 sm:$0xff]  }
 0x301   : > { %2795 = vmatprep.subr.bf16.mxu0 %v2944_v63 }
 0x304   : > { %2796 = vmatpush3.bf16.msra.mxu0 %v2944_v63  ;;  %v3135_v63 = vmov 0  }
 0x305   : > { %2138 = vmatprep.subr.bf16.mxu0 %v2951_v18  ;;  %v3008_v18 = vld [vmem:[%s3838_s15 + $0x88] ss:$28 sps:$4 sm:$0xff]  }
 0x3d2   : > { %v2785_v52 = vpop.f32.mrb[20].mxu0 }
 0x3d3   : > { %v1479_v54 = vpop.f32.mrb[21].mxu0  ;;  %v1488_v56 = vadd.f32 %v2785_v52, %v2531_v53  ;;  %v2984_v52 = vld [vmem:[%s3838_s15 + $0x124] ss:$28 sps:$4 sm:$0xff]  }
 0x3d4   : > { %v2786_v55 = vpop.f32.mrb[22].mxu0  ;;  %v1480_v58 = vadd.f32 %v2531_v53, %v1479_v54  ;;  %v2987_v54 = vld [vmem:[%s3838_s15 + $0x154] ss:$28 sps:$4 sm:$0xff]  }
 0x3d5   : > { %v1482_v57 = vpop.f32.mrb[23].mxu0  ;;  %v1494_v61 = vpack.c.bf16 %v1488_v56, %v1488_v56  ;;  %v2990_v55 = vld [vmem:[%s3838_s15 + $0x15c] ss:$28 sps:$4 sm:$0xff]   ;;  %v2985_v56 = vld [vmem:[%s3838_s15 + $0x150] ss:$28 sps:$4 sm:$0xff]  }
 0x3d6   : > { %v1483_v59 = vadd.f32 %v2531_v53, %v1482_v57  ;;  %v2982_v53 = vld [vmem:[%s3838_s15 + $0x120] ss:$28 sps:$4 sm:$0xff]   ;;  %v2988_v57 = vld [vmem:[%s3838_s15 + $0x158] ss:$28 sps:$4 sm:$0xff]  }
 0x3d8   : > { %v1493_v60 = vpack.c.bf16 %v1483_v59, %v1480_v58  ;;  %v2993_v58 = vld [vmem:[%s3838_s15 + $0x18c] ss:$28 sps:$4 sm:$0xff]   ;;  %v2996_v59 = vld [vmem:[%s3838_s15 + $0x194] ss:$28 sps:$4 sm:$0xff]  }
 0x3da   : > { %2789 = vmatprep.mubr.msk.bf16.mxu1 %vm988_vm0, %v1493_v60  ;;  %v2991_v60 = vld [vmem:[%s3838_s15 + $0x188] ss:$28 sps:$4 sm:$0xff]  }
 0x3db   : > { %2790 = vmatmul.mubr.msk.bf16.vlgmr.msra.gmra.mrb[16].mxu1 %vm988_vm0, %v1494_v61  ;;  %v2994_v61 = vld [vmem:[%s3838_s15 + $0x190] ss:$28 sps:$4 sm:$0xff]  }
 0x3dc   : > { %2802 = vmatpush3.bf16.msra.mxu1 %v2945_v0  ;;  %v3000_v0 = vld [vmem:[%s3838_s15 + $0x18] ss:$28 sps:$4 sm:$0xff]  }
 0x3dd   : > { %2803 = vmatprep.subr.bf16.mxu1 %v2946_v1 }
 0x3e0   : > { %2804 = vmatpush3.bf16.msra.mxu1 %v2946_v1  ;;  %v2545_v1 = vld [vmem:[%s3837_s14] ss:$0 sm:$0xff] }
 0x3e1   : > { %2805 = vmatprep.subr.bf16.mxu1 %v2947_v15 }
 0x3e4   : > { %2806 = vmatpush3.bf16.msra.mxu1 %v2947_v15  ;;  %v3001_v15 = vld [vmem:[%s3838_s15 + $0x48] ss:$28 sps:$4 sm:$0xff]  }
 0x3e5   : > { %2807 = vmatprep.subr.bf16.mxu1 %v2948_v16 }
 0x3e8   : > { %2808 = vmatpush3.bf16.msra.mxu1 %v2948_v16 }
 0x3e9   : > { %2189 = vmatprep.subr.bf16.mxu1 %v2954_v19  ;;  %v3005_v19 = vld [vmem:[%s3838_s15 + $0x80] ss:$28 sps:$4 sm:$0xff]  }
 0x4ae   : > { %v2791_v3 = vpop.f32.mrb[16].mxu1 }
 0x4af   : > { %v1559_v4 = vadd.f32 %v2791_v3, %v2536_v2  ;;  %v1550_v5 = vpop.f32.mrb[17].mxu1 }
 0x4b0   : > { %v1551_v6 = vadd.f32 %v2536_v2, %v1550_v5  ;;  %v2792_v7 = vpop.f32.mrb[18].mxu1 }
 0x4b1   : > { %v1553_v8 = vpop.f32.mrb[19].mxu1  ;;  %v1566_v10 = vmax.f32 %v1559_v4, 0.0 }
 0x4b2   : > { %v1554_v9 = vadd.f32 %v2536_v2, %v1553_v8  ;;  %v1564_v11 = vmax.f32 %v1551_v6, 0.0 }
 0x4b3   : > { %v1568_v14 = vpack.c.bf16 %v1566_v10, %v1566_v10  ;;  %v2997_v10 = vld [vmem:[%s3838_s15 + $0x10] ss:$28 sps:$4 sm:$0xff]  }
 0x4b4   : > { %v1565_v12 = vmax.f32 %v1554_v9, 0.0 }
 0x4b6   : > { %v1567_v13 = vpack.c.bf16 %v1565_v12, %v1564_v11 }
 0x4b8   : > { %2797 = vmatprep.mubr.msk.bf16.mxu0 %vm1438_vm2, %v1567_v13  ;;  %v3003_v13 = vld [vmem:[%s3838_s15 + $0x4c] ss:$28 sps:$4 sm:$0xff]  }
 0x4b9   : > { %2798 = vmatmul.mubr.msk.bf16.vlgmr.msra.gmra.mrb[24].mxu0 %vm1438_vm2, %v1568_v14  ;;  %v3004_v14 = vld [vmem:[%s3838_s15 + $0x50] ss:$28 sps:$4 sm:$0xff]  }
 0x4ba   : > { %2139 = vmatpush1.bf16.msra.mxu0 %v2949_v17  ;;  %2170 = vmatprep.mubr.bf16.mxu0 %v3135_v63  ;;  %v3007_v17 = vld [vmem:[%s3838_s15 + $0x84] ss:$28 sps:$4 sm:$0xff]  }
 0x4bb   : > { %2140 = vmatprep.subr.bf16.mxu0 %v2957_v20 }
 0x4be   : > { %2141 = vmatpush1.bf16.msra.mxu0 %v2955_v21  ;;  %v3011_v21 = vld [vmem:[%s3838_s15 + $0xbc] ss:$28 sps:$4 sm:$0xff]  }
 0x4bf   : > { %2142 = vmatprep.subr.bf16.mxu0 %v2963_v22  ;;  %v3012_v22 = vld [vmem:[%s3838_s15 + $0xc0] ss:$28 sps:$4 sm:$0xff]  }
 0x4c2   : > { %2143 = vmatpush1.bf16.msra.mxu0 %v2961_v23  ;;  %v3009_v23 = vld [vmem:[%s3838_s15 + $0xb8] ss:$28 sps:$4 sm:$0xff]  }
 0x4c3   : > { %2144 = vmatprep.subr.bf16.mxu0 %v2969_v24  ;;  %v3015_v24 = vld [vmem:[%s3838_s15 + $0xf4] ss:$28 sps:$4 sm:$0xff]  }
 0x4c6   : > { %2145 = vmatpush1.bf16.msra.mxu0 %v2967_v25  ;;  %v3016_v25 = vld [vmem:[%s3838_s15 + $0xf8] ss:$28 sps:$4 sm:$0xff]  }
 0x4c7   : > { %2146 = vmatprep.subr.bf16.mxu0 %v2975_v26  ;;  %v3013_v26 = vld [vmem:[%s3838_s15 + $0xf0] ss:$28 sps:$4 sm:$0xff]  }
 0x4ca   : > { %2147 = vmatpush1.bf16.msra.mxu0 %v2973_v27  ;;  %v3019_v27 = vld [vmem:[%s3838_s15 + $0x12c] ss:$28 sps:$4 sm:$0xff]  }
 0x4cb   : > { %2148 = vmatprep.subr.bf16.mxu0 %v2981_v28  ;;  %v3020_v28 = vld [vmem:[%s3838_s15 + $0x130] ss:$28 sps:$4 sm:$0xff]  }
 0x4ce   : > { %2149 = vmatpush1.bf16.msra.mxu0 %v2979_v29  ;;  %v3017_v29 = vld [vmem:[%s3838_s15 + $0x128] ss:$28 sps:$4 sm:$0xff]  }
 0x4cf   : > { %2150 = vmatprep.subr.bf16.mxu0 %v2987_v54 }
 0x4d2   : > { %2151 = vmatpush1.bf16.msra.mxu0 %v2985_v56 }
 0x4d3   : > { %2152 = vmatprep.subr.bf16.mxu0 %v2993_v58 }
 0x4d6   : > { %2153 = vmatpush1.bf16.msra.mxu0 %v2991_v60 }
 0x4d7   : > { %2240 = vmatprep.subr.bf16.mxu0 %v2999_v62 }
 0x58c   : > { %v2799_v31 = vpop.f32.mrb[24].mxu0 }
 0x58d   : > { %v1641_v32 = vadd.f32 %v2799_v31, %v2540_v30  ;;  %v1632_v33 = vpop.f32.mrb[25].mxu0  ;;  %v3024_v31 = vld [vmem:[%s3838_s15 + $0x168] ss:$28 sps:$4 sm:$0xff]  }
 0x58e   : > { %v1633_v34 = vadd.f32 %v2540_v30, %v1632_v33  ;;  %v2800_v35 = vpop.f32.mrb[26].mxu0  ;;  %v3027_v33 = vld [vmem:[%s3838_s15 + $0x19c] ss:$28 sps:$4 sm:$0xff]  }
 0x58f   : > { %v1635_v36 = vpop.f32.mrb[27].mxu0  ;;  %v1648_v38 = vmax.f32 %v1641_v32, 0.0  ;;  %v3021_v32 = vld [vmem:[%s3838_s15 + $0x160] ss:$28 sps:$4 sm:$0xff]   ;;  %v3025_v35 = vld [vmem:[%s3838_s15 + $0x198] ss:$28 sps:$4 sm:$0xff]  }
 0x590   : > { %v1636_v37 = vadd.f32 %v2540_v30, %v1635_v36  ;;  %v1646_v39 = vmax.f32 %v1633_v34, 0.0  ;;  %v3023_v30 = vld [vmem:[%s3838_s15 + $0x164] ss:$28 sps:$4 sm:$0xff]   ;;  %v1815_v36 = vlaneseq }
 0x591   : > { %v1650_v43 = vpack.c.bf16 %v1648_v38, %v1648_v38  ;;  %v3028_v34 = vld [vmem:[%s3838_s15 + $0x1a0] ss:$28 sps:$4 sm:$0xff]  }
 0x592   : > { %v1647_v40 = vmax.f32 %v1636_v37, 0.0  ;;  %v3721_v37 = vshrl.u32 %v1815_v36, 7 }
 0x594   : > { %v1649_v41 = vpack.c.bf16 %v1647_v40, %v1646_v39  ;;  %v1817_v38 = vsub.s32 0, %v3721_v37  ;;  %v1825_v39 = vsub.s32 2, %v3721_v37  ;;  %v3728_v40 = vld [vmem:[%s3839_s16] sm:$0x7f] }
 0x596   : > { %2809 = vmatprep.mubr.msk.bf16.mxu1 %vm1355_vm1, %v1649_v41  ;;  %v1821_v41 = vsub.s32 1, %v3721_v37 }
 0x597   : > { %2810 = vmatmul.mubr.msk.bf16.vlgmr.msra.gmra.mrb[20].mxu1 %vm1355_vm1, %v1650_v43  ;;  %v1818_v43 = vrot.slane %v3728_v40, %v1817_v38 }
 0x598   : > { %2190 = vmatpush1.bf16.msra.mxu1 %v2952_v42  ;;  %2221 = vmatprep.mubr.bf16.mxu1 %v3135_v63  ;;  %v1829_v42 = vsub.s32 3, %v3721_v37 }
 0x599   : > { %2191 = vmatprep.subr.bf16.mxu1 %v2960_v44  ;;  %v1826_v44 = vrot.slane %v3728_v40, %v1825_v39 }
 0x59c   : > { %2192 = vmatpush1.bf16.msra.mxu1 %v2958_v45  ;;  %v1822_v45 = vrot.slane %v3728_v40, %v1821_v41 }
 0x59d   : > { %2193 = vmatprep.subr.bf16.mxu1 %v2966_v46  ;;  %v1830_v46 = vrot.slane %v3728_v40, %v1829_v42 }
 0x5a0   : > { %2194 = vmatpush1.bf16.msra.mxu1 %v2964_v47 }
 0x5a1   : > { %2195 = vmatprep.subr.bf16.mxu1 %v2972_v48 }
 0x5a4   : > { %2196 = vmatpush1.bf16.msra.mxu1 %v2970_v49 }
 0x5a5   : > { %2197 = vmatprep.subr.bf16.mxu1 %v2978_v50 }
 0x5a8   : > { %2198 = vmatpush1.bf16.msra.mxu1 %v2976_v51 }
 0x5a9   : > { %2199 = vmatprep.subr.bf16.mxu1 %v2984_v52 }
 0x5ac   : > { %2200 = vmatpush1.bf16.msra.mxu1 %v2982_v53 }
 0x5ad   : > { %2201 = vmatprep.subr.bf16.mxu1 %v2990_v55 }
 0x5b0   : > { %2202 = vmatpush1.bf16.msra.mxu1 %v2988_v57 }
 0x5b1   : > { %2203 = vmatprep.subr.bf16.mxu1 %v2996_v59 }
 0x5b4   : > { %2204 = vmatpush1.bf16.msra.mxu1 %v2994_v61 }
 0x5b5   : > { %2813 = vmatprep.subr.bf16.mxu1 %v3000_v0 }
 0x66a   : > { %v2811_v2 = vpop.f32.mrb[20].mxu1 }
 0x66b   : > { %v1730_v3 = vpop.f32.mrb[21].mxu1  ;;  %v1739_v11 = vadd.f32 %v2811_v2, %v2545_v1 }
 0x66c   : > { %v1731_v4 = vadd.f32 %v2545_v1, %v1730_v3  ;;  %v2812_v5 = vpop.f32.mrb[22].mxu1 }
 0x66d   : > { %v1733_v6 = vpop.f32.mrb[23].mxu1  ;;  %v1746_v16 = vmax.f32 %v1739_v11, 0.0 }
 0x66e   : > { %v1734_v7 = vadd.f32 %v2545_v1, %v1733_v6  ;;  %v1744_v8 = vmax.f32 %v1731_v4, 0.0 }
 0x66f   : > { %v1748_v20 = vpack.c.bf16 %v1746_v16, %v1746_v16 }
 0x670   : > { %v1745_v9 = vmax.f32 %v1734_v7, 0.0 }
 0x672   : > { %v1747_v12 = vpack.c.bf16 %v1745_v9, %v1744_v8 }
 0x674   : > { %2171 = vmatmul.mubr.bf16.vlgmr.msra.gmra.mrb[28].mxu0 %v1747_v12  ;;  %2222 = vmatmul.mubr.bf16.vlgmr.msra.gmra.mrb[24].mxu1 %v1747_v12 }
 0x675   : > { %2241 = vmatpush1.bf16.msra.mxu0 %v2997_v10  ;;  %2814 = vmatpush3.bf16.msra.mxu1 %v3000_v0 }
 0x676   : > { %2242 = vmatprep.subr.bf16.mxu0 %v3003_v13  ;;  %2815 = vmatprep.subr.bf16.mxu1 %v3004_v14 }
 0x677   : > { %2180 = vmatprep.mubr.bf16.mxu0 %v3135_v63  ;;  %2231 = vmatprep.mubr.bf16.mxu1 %v3135_v63 }
 0x679   : > { %2243 = vmatpush1.bf16.msra.mxu0 %v3001_v15  ;;  %2816 = vmatpush3.bf16.msra.mxu1 %v3004_v14 }
 0x67a   : > { %2244 = vmatprep.subr.bf16.mxu0 %v3007_v17  ;;  %2817 = vmatprep.subr.bf16.mxu1 %v3008_v18 }
 0x67c   : > { %2181 = vmatmul.mubr.bf16.gmra.mrb[32].mxu0 %v1748_v20  ;;  %2232 = vmatmul.mubr.bf16.gmra.mrb[28].mxu1 %v1748_v20 }
 0x67d   : > { %2245 = vmatpush1.bf16.msra.mxu0 %v3005_v19  ;;  %2818 = vmatpush3.bf16.msra.mxu1 %v3008_v18 }
 0x67e   : > { %2829 = vmatprep.mubr.bf16.mxu1 %v1747_v12  ;;  %2246 = vmatprep.subr.bf16.mxu0 %v3011_v21 }
 0x67f   : > { %2819 = vmatprep.subr.bf16.mxu1 %v3012_v22  ;;  %2272 = vmatprep.mubr.bf16.mxu0 %v3135_v63 }
 0x681   : > { %2247 = vmatpush1.bf16.msra.mxu0 %v3009_v23  ;;  %2820 = vmatpush3.bf16.msra.mxu1 %v3012_v22  ;;  %v1833_v23 = vsub.s32 4, %v3721_v37 }
 0x682   : > { %2248 = vmatprep.subr.bf16.mxu0 %v3015_v24  ;;  %2821 = vmatprep.subr.bf16.mxu1 %v3016_v25  ;;  %v1841_v24 = vsub.s32 6, %v3721_v37 }
 0x685   : > { %2249 = vmatpush1.bf16.msra.mxu0 %v3013_v26  ;;  %2822 = vmatpush3.bf16.msra.mxu1 %v3016_v25  ;;  %v1837_v25 = vsub.s32 5, %v3721_v37  ;;  %v1834_v26 = vrot.slane %v3728_v40, %v1833_v23 }
 0x686   : > { %2250 = vmatprep.subr.bf16.mxu0 %v3019_v27  ;;  %2823 = vmatprep.subr.bf16.mxu1 %v3020_v28  ;;  %v1842_v27 = vrot.slane %v3728_v40, %v1841_v24 }
 0x689   : > { %2251 = vmatpush1.bf16.msra.mxu0 %v3017_v29  ;;  %2824 = vmatpush3.bf16.msra.mxu1 %v3020_v28  ;;  %v1838_v28 = vrot.slane %v3728_v40, %v1837_v25 }
 0x68a   : > { %2252 = vmatprep.subr.bf16.mxu0 %v3023_v30  ;;  %2825 = vmatprep.subr.bf16.mxu1 %v3024_v31 }
 0x68d   : > { %2253 = vmatpush1.bf16.msra.mxu0 %v3021_v32  ;;  %2826 = vmatpush3.bf16.msra.mxu1 %v3024_v31 }
 0x68e   : > { %2254 = vmatprep.subr.bf16.mxu0 %v3027_v33  ;;  %2827 = vmatprep.subr.bf16.mxu1 %v3028_v34 }
 0x691   : > { %2255 = vmatpush1.bf16.msra.mxu0 %v3025_v35  ;;  %2828 = vmatpush3.bf16.msra.mxu1 %v3028_v34 }
 0x694   : > { %2273 = vmatmul.mubr.bf16.vlgmr.msra.gmra.mrb[36].mxu0 %v1747_v12  ;;  %2830 = vmatmul.mubr.bf16.vlgmr.msra.gmra.mrb[32].mxu1 %v1748_v20 }
 0x695   : > { %2282 = vmatprep.mubr.bf16.mxu0 %v3135_v63 }
 0x69c   : > { %2283 = vmatmul.mubr.bf16.gmra.mrb[40].mxu0 %v1748_v20 }
 0x747   : > { %v2172_v47 = vpop.f32.mrb[28].mxu0  ;;  %v2223_v48 = vpop.f32.mrb[24].mxu1 }
 0x748   : > { %v2173_v49 = vadd.f32 %v2172_v47, %v1818_v43  ;;  %v2224_v50 = vadd.f32 %v2223_v48, %v1826_v44  ;;  %v2174_v51 = vpop.f32.mrb[29].mxu0  ;;  %v2225_v52 = vpop.f32.mrb[25].mxu1 }
 0x749   : > { %v2175_v53 = vadd.f32 %v2174_v51, %v1822_v45  ;;  %v2226_v54 = vadd.f32 %v2225_v52, %v1830_v46  ;;  %v2176_v55 = vpop.f32.mrb[30].mxu0  ;;  %v2227_v56 = vpop.f32.mrb[26].mxu1 }
 0x74a   : > { %3029 = vtanh.f32 %v2173_v49  ;;  %v2177_v57 = vadd.f32 %v2176_v55, %v1818_v43  ;;  %v2178_v58 = vpop.f32.mrb[31].mxu0  ;;  %v2229_v59 = vpop.f32.mrb[27].mxu1  ;;  %v2228_v60 = vadd.f32 %v2227_v56, %v1826_v44 }
 0x74b   : > { %3031 = vtanh.f32 %v2224_v50  ;;  %v2179_v61 = vadd.f32 %v2178_v58, %v1822_v45  ;;  %v2230_v62 = vadd.f32 %v2229_v59, %v1830_v46 }
 0x74c   : > { %3033 = vtanh.f32 %v2175_v53 }
 0x74d   : > { %3035 = vtanh.f32 %v2226_v54 }
 0x74e   : > { %3037 = vtanh.f32 %v2177_v57 }
 0x74f   : > { %3039 = vtanh.f32 %v2228_v60  ;;  %v2182_v63 = vpop.f32.mrb[32].mxu0  ;;  %v2233_v0 = vpop.f32.mrb[28].mxu1 }
 0x750   : > { %3041 = vtanh.f32 %v2179_v61  ;;  %v2183_v1 = vadd.f32 %v2182_v63, %v1818_v43  ;;  %v2234_v2 = vadd.f32 %v2233_v0, %v1826_v44  ;;  %v2184_v3 = vpop.f32.mrb[33].mxu0  ;;  %v2235_v4 = vpop.f32.mrb[29].mxu1 }
 0x751   : > { %3043 = vtanh.f32 %v2230_v62  ;;  %v2185_v5 = vadd.f32 %v2184_v3, %v1822_v45  ;;  %v2236_v6 = vadd.f32 %v2235_v4, %v1830_v46  ;;  %v2186_v7 = vpop.f32.mrb[34].mxu0  ;;  %v2237_v8 = vpop.f32.mrb[30].mxu1 }
 0x752   : > { %3045 = vtanh.f32 %v2183_v1  ;;  %v2187_v9 = vpop.f32.mrb[35].mxu0  ;;  %v2238_v10 = vpop.f32.mrb[31].mxu1 }
 0x753   : > { %3047 = vtanh.f32 %v2234_v2 }
 0x754   : > { %v3030_v11 = vpop.eup %3029  ;;  %3049 = vtanh.f32 %v2185_v5 }
 0x755   : > { %v3032_v12 = vpop.eup %3031  ;;  %2360 = vst [vmem:[%s3739_s29] sm:$0xff] %v3030_v11  ;;  %3051 = vtanh.f32 %v2236_v6 }
 0x756   : > { %v3034_v13 = vpop.eup %3033  ;;  %2362 = vst [vmem:[%s3739_s29 + $0x10] sm:$0xff] %v3032_v12 }
 0x757   : > { %v3036_v14 = vpop.eup %3035  ;;  %2361 = vst [vmem:[%s3739_s29 + $0x8] sm:$0xff] %v3034_v13 }
 0x758   : > { %v3038_v15 = vpop.eup %3037  ;;  %2363 = vst [vmem:[%s3739_s29 + $0x18] sm:$0xff] %v3036_v14 }
 0x759   : > { %v3040_v16 = vpop.eup %3039  ;;  %2367 = vst [vmem:[%s3739_s29 + $0x38] sm:$0xff] %v3038_v15 }
 0x75a   : > { %v3042_v17 = vpop.eup %3041  ;;  %2369 = vst [vmem:[%s3739_s29 + $0x48] sm:$0xff] %v3040_v16 }
 0x75b   : > { %v3044_v18 = vpop.eup %3043  ;;  %2368 = vst [vmem:[%s3739_s29 + $0x40] sm:$0xff] %v3042_v17 }
 0x75c   : > { %v3046_v19 = vpop.eup %3045  ;;  %2370 = vst [vmem:[%s3739_s29 + $0x50] sm:$0xff] %v3044_v18 }
 0x75d   : > { %v3048_v20 = vpop.eup %3047  ;;  %2374 = vst [vmem:[%s3739_s29 + $0x70] sm:$0xff] %v3046_v19 }
 0x75e   : > { %v3050_v21 = vpop.eup %3049  ;;  %2376 = vst [vmem:[%s3739_s29 + $0x80] sm:$0xff] %v3048_v20 }
 0x75f   : > { %v3052_v22 = vpop.eup %3051  ;;  %2375 = vst [vmem:[%s3739_s29 + $0x78] sm:$0xff] %v3050_v21 }
 0x760   : > { %2377 = vst [vmem:[%s3739_s29 + $0x88] sm:$0xff] %v3052_v22 }
 0x767   : > { %v2274_v29 = vpop.f32.mrb[36].mxu0  ;;  %v2831_v30 = vpop.f32.mrb[32].mxu1 }
 0x768   : > { %v2275_v31 = vadd.f32 %v2274_v29, %v1834_v26  ;;  %v2334_v32 = vadd.f32 %v2831_v30, %v1842_v27  ;;  %v2276_v33 = vpop.f32.mrb[37].mxu0  ;;  %v2325_v34 = vpop.f32.mrb[33].mxu1 }
 0x769   : > { %v2277_v35 = vadd.f32 %v2276_v33, %v1838_v28  ;;  %v2326_v36 = vadd.f32 %v2325_v34, %v1842_v27  ;;  %v2278_v38 = vpop.f32.mrb[38].mxu0  ;;  %v2832_v39 = vpop.f32.mrb[34].mxu1 }
 0x76a   : > { %3053 = vtanh.f32 %v2275_v31  ;;  %v2279_v41 = vadd.f32 %v2278_v38, %v1834_v26  ;;  %v2280_v42 = vpop.f32.mrb[39].mxu0  ;;  %v2328_v37 = vpop.f32.mrb[35].mxu1 }
 0x76b   : > { %3055 = vtanh.f32 %v2334_v32  ;;  %v2281_v43 = vadd.f32 %v2280_v42, %v1838_v28  ;;  %v2329_v44 = vadd.f32 %v2328_v37, %v1842_v27 }
 0x76c   : > { %3057 = vtanh.f32 %v2277_v35 }
 0x76d   : > { %3059 = vtanh.f32 %v2326_v36 }
 0x76e   : > { %3061 = vtanh.f32 %v2279_v41 }
 0x76f   : > { %3063 = vtanh.f32 %v2281_v43  ;;  %v2284_v40 = vpop.f32.mrb[40].mxu0 }
 0x770   : > { %3065 = vtanh.f32 %v2329_v44  ;;  %v2285_v45 = vadd.f32 %v2284_v40, %v1834_v26  ;;  %v2286_v46 = vpop.f32.mrb[41].mxu0 }
 0x771   : > { %v2287_v47 = vadd.f32 %v2286_v46, %v1838_v28  ;;  %v2288_v48 = vpop.f32.mrb[42].mxu0 }
 0x772   : > { %3067 = vtanh.f32 %v2285_v45  ;;  %v2289_v49 = vpop.f32.mrb[43].mxu0 }
 0x773   : > { %3069 = vtanh.f32 %v2287_v47 }
 0x774   : > { %v3054_v50 = vpop.eup %3053 }
 0x775   : > { %v3056_v51 = vpop.eup %3055  ;;  %2364 = vst [vmem:[%s3739_s29 + $0x20] sm:$0xff] %v3054_v50 }
 0x776   : > { %v3058_v52 = vpop.eup %3057  ;;  %2380 = vst.msk [vmem:[%s3739_s29 + $0xa0] sm:$0xff] %vm988_vm0, %v3056_v51 }
 0x777   : > { %v3060_v53 = vpop.eup %3059  ;;  %2365 = vst [vmem:[%s3739_s29 + $0x28] sm:$0xff] %v3058_v52 }
 0x778   : > { %v3062_v54 = vpop.eup %3061  ;;  %2366 = vst.msk [vmem:[%s3739_s29 + $0x30] sm:$0xff] %vm988_vm0, %v3060_v53 }
 0x779   : > { %v3064_v55 = vpop.eup %3063  ;;  %2371 = vst [vmem:[%s3739_s29 + $0x58] sm:$0xff] %v3062_v54 }
 0x77a   : > { %v3066_v56 = vpop.eup %3065  ;;  %2372 = vst [vmem:[%s3739_s29 + $0x60] sm:$0xff] %v3064_v55 }
 0x77b   : > { %2373 = vst.msk [vmem:[%s3739_s29 + $0x68] sm:$0xff] %vm988_vm0, %v3066_v56 }
 0x77c   : > { %v3068_v57 = vpop.eup %3067 }
 0x77d   : > { %v3070_v58 = vpop.eup %3069  ;;  %2378 = vst [vmem:[%s3739_s29 + $0x90] sm:$0xff] %v3068_v57 }
 0x77e   : > { %2379 = vst [vmem:[%s3739_s29 + $0x98] sm:$0xff] %v3070_v58 }
 0x77f   : > { %3084 = shalt.err (!%p3081_p3)
}
 0x780   : > { %s3085_s0 = scalar_lea.hbm %s3776_s19, 2688  ;;  %s3089_s24 = scalar_lea.hbm %s3862_s17, 5376 }
 0x781   : > { %p3086_p4 = scmp.ne.s32.totalorder %s3776_s19, %s3085_s0  ;;  %p3090_p9 = scmp.lt.u32.totalorder %s3776_s19, %s3862_s17 }
 0x782   : > { %p3091_p10 = scmp.lt.u32.totalorder %s3089_s24, %s3085_s0  ;;  %p3093_p12 = scmp.lt.u32.totalorder %s3085_s0, %s3776_s19 }
 0x783   : > { %p3087_p7 = pnand %p3086_p4, %p3267_p5 }
 0x784   : > { %p3092_p11 = por %p3091_p10, %p3090_p9 }
 0x785   : > { %p3088_p8 = pneg %p3087_p7 }
 0x786   : > { %p3094_p13 = por %p3093_p12, %p3092_p11 }
 0x788   : > { %p3095_p0 = pnand %p3094_p13, %p3088_p8 }
 0x78a   : > { %3098 = shalt.err (!%p3095_p0)
}
 0x78b   : > { %s3137_s30 = smov 896   ;;  %s3138_s22 = smov 56  }
 0x78c   : > { %2836 = dma.vmem_to_hbm [thread:$0]  (%p3267_p5), %s3771_s27, 2688, %s3776_s19, %s3782_s28, %s3137_s30, %s3137_s30, %s3138_s22  }
 0x78d PF: > { %s3863_s18 = sld [smem:[#allocation7_spill]]  ;;  %s3864_s29 = sld [smem:[#allocation5_spill]] }
 0x793   : > { %p2843_p1 = scmp.ge.s32.totalorder %s3863_s18, 2  ;;  %s2411_s20 = sand.u32 1, %s3864_s29  }
 0x794   : > { %s2412_s0 = scalar_lea.sflag [#allocation3], %s2411_s20 }
 0x795   : > { %p2839_p2 = pnand %p2843_p1, %p3271_p6 }
 0x797   : > { %3116 = dma.done.wait (!%p2839_p2), %s2412_s0, 2688  }
 0x798   : > { %3118 = vsyncadd (!%p2839_p2), %s2412_s0, 4294964608  ;;  %s3866_s27 = sld [smem:[#allocation8_spill]]  ;;  %s3867_s21 = sld [smem:[#allocation6_spill]] }
 0x799   : > { %s3868_s26 = sld [smem:[#allocation9_spill]]  ;;  %s3869_s24 = smov %s3125_s25 }
 0x79e   : > { %p27_p3 = scmp.ge.s32.totalorder %s3866_s27, 4   ;;  %s3870_s25 = smov %s3867_s21 }
 0x7a0   :  { %29 = sbr.rel (!%p27_p3) target bundleno = 7 (0x7), region = 123 }
 0x7a7   :  { %2417 = vsyncpa [#allocation3], 1 }
 0x7a8   :  { %2419 = vsyncpa [#allocation3 + $0x1], 1 }

</bundles_post_ra>
